<compile_context>
chip_gen: v5e
topology: v5e:2x2
jax: 0.10.0
libtpu: 0.0.40
codegen_flags: <defaults>
</compile_context>

<pallas_src>
import functools

import jax
import jax.numpy as jnp
from jax import lax
from jax.experimental import pallas as pl
from jax.experimental.pallas import tpu as pltpu


def _vmem_capacity_bytes():
    try:
        return int(pltpu.get_tpu_info().vmem_capacity_bytes)
    except Exception:
        return 64 << 20  # conservative (v7x-sized) fallback


# ----------------------------------------------------------------------------- #
# Tiled, pipelined linear: y = x @ w_t + b   (w_t already transposed to (Din, Dout))
# ----------------------------------------------------------------------------- #
def _linear_kernel(x_ref, w_ref, b_ref, o_ref, acc_ref):
    @pl.when(pl.program_id(2) == 0)
    def _():
        acc_ref[...] = jnp.zeros_like(acc_ref)

    acc_ref[...] += jnp.dot(x_ref[...], w_ref[...],
                            preferred_element_type=jnp.float32)

    @pl.when(pl.program_id(2) == pl.num_programs(2) - 1)
    def _():
        o_ref[...] = (acc_ref[...] + b_ref[...]).astype(o_ref.dtype)


def _choose_tile(dim, pref, align):
    """Largest block size <= pref that is align-multiple and divides dim, else full."""
    if dim <= pref:
        return dim
    t = (pref // align) * align
    while t >= align:
        if dim % t == 0:
            return t
        t -= align
    return dim


def pallas_linear(x2d, w_t, b):
    """x2d (M, Din) @ w_t (Din, Dout) + b, f32 accumulation, f32 output."""
    M, Din = x2d.shape
    Dout = w_t.shape[1]
    big_vmem = _vmem_capacity_bytes() >= (96 << 20)       # v5e / v6e 128 MiB parts
    tm = _choose_tile(M, 1024 if big_vmem else 512, 8)
    tn = _choose_tile(Dout, 256, 128)
    tk = _choose_tile(Din, 1024 if big_vmem else 512, 128)
    b_row = b.reshape(1, Dout).astype(jnp.float32)
    return pl.pallas_call(
        _linear_kernel,
        out_shape=jax.ShapeDtypeStruct((M, Dout), jnp.float32),
        grid=(M // tm, Dout // tn, Din // tk),
        in_specs=[
            pl.BlockSpec((tm, tk), lambda i, j, kk: (i, kk)),
            pl.BlockSpec((tk, tn), lambda i, j, kk: (kk, j)),
            pl.BlockSpec((1, tn), lambda i, j, kk: (0, j)),
        ],
        out_specs=pl.BlockSpec((tm, tn), lambda i, j, kk: (i, j)),
        scratch_shapes=[pltpu.VMEM((tm, tn), jnp.float32)],
        compiler_params=pltpu.CompilerParams(
            dimension_semantics=("parallel", "parallel", "arbitrary")),
    )(x2d, w_t, b_row)


# ----------------------------------------------------------------------------- #
# Fused ConvNN attention kernel: one (batch, head) pair per grid step.
#   magnitude matrix (f32) -> iterative top-K (f32, exact lowest-index tie-break)
#   -> conv folded BEFORE the gather: Y = W_stack @ V^T (one bf16 matmul)
#   -> per tap: acc += Y_j @ pick_j^T (lane-dense (d_k, S) MXU matmuls)
# ----------------------------------------------------------------------------- #
def _convnn_attn_kernel(q_ref, k_ref, v_ref, w_ref, b_ref, o_ref, *,
                        K, maximum, magnitude_type):
    S, d_k = q_ref.shape[1], q_ref.shape[2]
    qh = q_ref[0]                        # (S, d_k) f32
    kh = k_ref[0]                        # (S, d_k) f32
    vh = v_ref[0]                        # (S, d_k) bf16
    w_stack = w_ref[...]                 # (K*d_k, d_k) bf16
    b_col = b_ref[...]                   # (d_k, 1)  f32

    if magnitude_type == "similarity":
        # TODO(synk): lax.rsqrt (EUP) would be cheaper, but keep /sqrt so the
        # normalized values (and hence top-K indices) match the f32 reference.
        kn = kh / jnp.maximum(jnp.sqrt(jnp.sum(kh * kh, axis=1, keepdims=True)), 1e-12)
        qn = qh / jnp.maximum(jnp.sqrt(jnp.sum(qh * qh, axis=1, keepdims=True)), 1e-12)
        mag = lax.dot_general(kn, qn, (((1,), (1,)), ((), ())),
                              preferred_element_type=jnp.float32)        # (S,S)
        mag = jnp.maximum(mag, 0.0)
    else:  # 'distance' -- matches torch broadcasting: |k_m|^2 + |q_i|^2 - 2 k_i.q_m
        dkq = lax.dot_general(kh, qh, (((1,), (1,)), ((), ())),
                              preferred_element_type=jnp.float32)        # (S,S)
        nq_col = jnp.sum(qh * qh, axis=1, keepdims=True)                 # (S,1)
        nk_row = lax.dot_general(jnp.ones((1, d_k), jnp.float32), kh * kh,
                                 (((1,), (1,)), ((), ())),
                                 preferred_element_type=jnp.float32)     # (1,S)
        mag = jnp.sqrt(jnp.maximum(nk_row + nq_col - 2.0 * dkq, 0.0))

    # Strided Conv1d (kernel=stride=K) applied before the gather:
    #   Y[j*d_k + o, t] = sum_c W[o, c, j] * v[c, t]
    y_full = lax.dot_general(w_stack, vh, (((1,), (1,)), ((), ())),
                             preferred_element_type=jnp.float32)         # (K*d_k, S)
    y_full = y_full.astype(jnp.bfloat16)

    col_iota = lax.broadcasted_iota(jnp.int32, (1, S), 1)   # (1,S), no (S,S) iota
    mask_val = -jnp.inf if maximum else jnp.inf

    acc = jnp.zeros((d_k, S), jnp.float32)
    for j in range(K):                   # K is a small static int -> unrolled
        if maximum:
            best = jnp.max(mag, axis=-1, keepdims=True)                  # (S,1)
        else:
            best = jnp.min(mag, axis=-1, keepdims=True)
        # first (lowest) index reaching the extremum == lax.top_k tie order.
        # TODO(synk): fold value-reduce + index tie-break into one XLU reduction
        # via a packed monotonic key (v6e/v7x micro-opt) keeping exact tie semantics.
        sel = jnp.min(jnp.where(mag == best, col_iota, S), axis=-1, keepdims=True)
        pick = col_iota == sel                                           # (S,S)
        if j + 1 < K:                    # skip dead masking on the last tap
            mag = jnp.where(pick, mask_val, mag)
        onehot = pick.astype(jnp.bfloat16)                               # exact 0/1
        y_j = y_full[j * d_k:(j + 1) * d_k, :]                           # (d_k, S)
        # C_j[o, i] = Y_j[o, idx[i, j]]  -- lane-dense (d_k, S) result on the MXU
        acc += lax.dot_general(y_j, onehot, (((1,), (1,)), ((), ())),
                               preferred_element_type=jnp.float32)
    o_ref[0] = (acc + b_col).astype(o_ref.dtype)


# ----------------------------------------------------------------------------- #
# Module forward
# ----------------------------------------------------------------------------- #
def multi_head_convnn_attention(x, params, *, num_heads, K, magnitude_type):
    B, S, d_model = x.shape
    assert d_model % num_heads == 0
    d_k = d_model // num_heads
    assert K <= S, "K (top-k / conv kernel size) must be <= sequence length"
    maximum = magnitude_type == "similarity"
    BH = B * num_heads

    x2d = x.reshape(B * S, d_model).astype(jnp.float32)

    # Fused QKV projection: x read from HBM once, one launch (f32 so the top-K
    # selection driven by Q/K matches the f32 reference exactly).
    wqkv_t = jnp.concatenate([params["wq"], params["wk"], params["wv"]], axis=0).T
    bqkv = jnp.concatenate([params["bq"], params["bk"], params["bv"]], axis=0)
    qkv = pallas_linear(x2d, wqkv_t, bqkv)                   # (B*S, 3*d_model) f32
    qkv = jnp.transpose(qkv.reshape(B, S, 3, num_heads, d_k), (2, 0, 3, 1, 4))
    q = qkv[0].reshape(BH, S, d_k)                           # (BH, S, d_k) f32
    k = qkv[1].reshape(BH, S, d_k)
    v = qkv[2].reshape(BH, S, d_k).astype(jnp.bfloat16)      # kernel consumes bf16 V

    # conv weight (out, in, K) -> (K*out, in): W_stack[j*d_k + o, c] = W[o, c, j]
    w_stack = jnp.transpose(params["w_conv"], (2, 0, 1)).reshape(K * d_k, d_k)
    w_stack = w_stack.astype(jnp.bfloat16)
    b_col = params["b_conv"].reshape(d_k, 1).astype(jnp.float32)

    kernel = functools.partial(_convnn_attn_kernel, K=K, maximum=maximum,
                               magnitude_type=magnitude_type)

    # Per-step VMEM: double-buffered q/k/v/out blocks + (S,S) selection temporaries.
    vmem_cap = _vmem_capacity_bytes()
    need = (2 * (2 * S * d_k * 4 + S * d_k * 2 + d_k * S * 2)     # q,k f32; v,out bf16
            + 2 * K * d_k * d_k * 2 + d_k * 4                     # weights / bias
            + 8 * S * S * 4 + 4 * K * d_k * S * 4                 # mag/pick/Y/acc temps
            + (4 << 20))                                          # headroom
    vmem_limit = int(min(max(need, 32 << 20), int(vmem_cap * 0.8)))

    flops = BH * (2 * S * S * d_k + 2 * K * d_k * d_k * S + K * 2 * d_k * S * S)
    transcend = BH * (2 * S if magnitude_type == "similarity" else S * S)
    bytes_acc = (BH * (2 * S * d_k * 4 + S * d_k * 2 + d_k * S * 2)
                 + K * d_k * d_k * 2 + d_k * 4)
    cost = pl.CostEstimate(flops=flops, transcendentals=transcend,
                           bytes_accessed=bytes_acc)

    conv_cf = pl.pallas_call(
        kernel,
        out_shape=jax.ShapeDtypeStruct((BH, d_k, S), jnp.bfloat16),
        grid=(BH,),
        in_specs=[
            pl.BlockSpec((1, S, d_k), lambda n: (n, 0, 0)),
            pl.BlockSpec((1, S, d_k), lambda n: (n, 0, 0)),
            pl.BlockSpec((1, S, d_k), lambda n: (n, 0, 0)),
            pl.BlockSpec((K * d_k, d_k), lambda n: (0, 0)),
            pl.BlockSpec((d_k, 1), lambda n: (0, 0)),
        ],
        out_specs=pl.BlockSpec((1, d_k, S), lambda n: (n, 0, 0)),
        compiler_params=pltpu.CompilerParams(
            dimension_semantics=("parallel",),
            vmem_limit_bytes=vmem_limit),
        cost_estimate=cost,
    )(q, k, v, w_stack, b_col)          # (BH, d_k, S) bf16, channels-first per head

    # Composite of conv.permute(0,2,1) -> batch_split -> combine_heads (exact torch
    # reshape/permute semantics, also correct when S != d_k):
    p = jnp.swapaxes(conv_cf, 1, 2)                      # (BH, S, d_k)
    g = p.reshape(B, num_heads, d_k, S)                  # raw reinterpretation
    y = jnp.transpose(g, (0, 3, 1, 2)).reshape(B * S, d_model)   # (B*S, d_model) bf16

    wo_t = params["wo"].T.astype(jnp.bfloat16)           # bf16 MXU path, f32 accumulate
    out = pallas_linear(y, wo_t, params["bo"])
    return out.reshape(B, S, d_model)


# ----------------------------------------------------------------------------- #
# Pure-JAX f32 reference (mirrors the torch ops) for a sanity check
# ----------------------------------------------------------------------------- #
def reference(x, params, *, num_heads, K, magnitude_type):
    B, S, d_model = x.shape
    d_k = d_model // num_heads
    hi = jax.lax.Precision.HIGHEST

    def linear(x3, w, b):
        return jnp.dot(x3, w.T, precision=hi) + b

    def to_heads(y):
        y = y.reshape(B, S, num_heads, d_k).transpose(0, 2, 1, 3)
        return y.transpose(0, 1, 3, 2).reshape(B * num_heads, d_k, S)

    q = to_heads(linear(x, params["wq"], params["bq"]))
    k = to_heads(linear(x, params["wk"], params["bk"]))
    v = to_heads(linear(x, params["wv"], params["bv"]))

    if magnitude_type == "similarity":
        kn = k / jnp.maximum(jnp.linalg.norm(k, axis=1, keepdims=True), 1e-12)
        qn = q / jnp.maximum(jnp.linalg.norm(q, axis=1, keepdims=True), 1e-12)
        mag = jnp.maximum(jnp.einsum("bci,bcm->bim", kn, qn, precision=hi), 0.0)
        _, idx = lax.top_k(mag, K)
    else:
        dot = jnp.einsum("bci,bcm->bim", k, q, precision=hi)
        nk = jnp.sum(k * k, axis=1, keepdims=True)                 # (BH,1,S)
        nq = jnp.sum(q * q, axis=1, keepdims=True)                 # (BH,1,S)
        mag = jnp.sqrt(jnp.maximum(nk + jnp.swapaxes(nq, 1, 2) - 2 * dot, 0.0))
        _, idx = lax.top_k(-mag, K)

    vg = jax.vmap(lambda vb, ib: vb[:, ib])(v, idx)                # (BH, d_k, S, K)
    conv = (jnp.einsum("bcij,ocj->boi", vg, params["w_conv"], precision=hi)
            + params["b_conv"][None, :, None])
    y_t = jnp.transpose(conv, (0, 2, 1))
    y = y_t.reshape(B, num_heads, d_k, S).transpose(0, 1, 3, 2)
    y = y.transpose(0, 2, 1, 3).reshape(B, S, d_model)
    return linear(y, params["wo"], params["bo"])


# ----------------------------------------------------------------------------- #
def init_params(key, d_model, d_k, K):
    ks = jax.random.split(key, 10)

    def uinit(kk, shape, fan_in):
        bound = 1.0 / float(fan_in) ** 0.5
        return jax.random.uniform(kk, shape, jnp.float32, -bound, bound)

    p = {}
    for i, name in enumerate(["q", "k", "v", "o"]):
        p[f"w{name}"] = uinit(ks[2 * i], (d_model, d_model), d_model)
        p[f"b{name}"] = uinit(ks[2 * i + 1], (d_model,), d_model)
    p["w_conv"] = uinit(ks[8], (d_k, d_k, K), d_k * K)
    p["b_conv"] = uinit(ks[9], (d_k,), d_k * K)
    return p


if __name__ == "__main__":
    # S != d_k on purpose, to validate the post-conv reshape/permute composite.
    B, S, d_model, num_heads, K = 2, 16, 32, 4, 3
    d_k = d_model // num_heads
    magnitude_type = "similarity"   # samples=0 -> the samples=None branch of the module

    key = jax.random.PRNGKey(0)
    k_x, k_p = jax.random.split(key)
    x = jax.random.normal(k_x, (B, S, d_model), jnp.float32)
    params = init_params(k_p, d_model, d_k, K)

    out = multi_head_convnn_attention(
        x, params, num_heads=num_heads, K=K, magnitude_type=magnitude_type)
    out = jax.block_until_ready(out)

    ref = reference(x, params, num_heads=num_heads, K=K, magnitude_type=magnitude_type)
    assert out.shape == (B, S, d_model)
    # V / conv / W_o run on the bf16 MXU path (f32 accumulate); magnitude + top-K
    # selection stay f32, so only bf16-rounding-level error vs. the f32 reference.
    assert jnp.allclose(out, ref, atol=3e-2, rtol=3e-2), "mismatch vs. reference"

    # TODO(synk): the samples != 0 branch needs torch.randperm-style sampling and
    # in-place masked index assignment; not implemented (module used with samples=0).
    print("KERNEL_OK")
</pallas_src>

<mosaic_0001>
module attributes {stable_mosaic.version = 11 : i64} {
  func.func @_linear_kernel(%arg0: i32, %arg1: i32, %arg2: i32, %arg3: memref<32x32xf32, #tpu.memory_space<vmem>>, %arg4: memref<32x96xf32, #tpu.memory_space<vmem>>, %arg5: memref<1x96xf32, #tpu.memory_space<vmem>>, %arg6: memref<32x96xf32, #tpu.memory_space<vmem>>, %arg7: memref<32x96xf32, #tpu.memory_space<vmem>>) attributes {dimension_semantics = [#tpu.dimension_semantics<parallel>, #tpu.dimension_semantics<parallel>, #tpu.dimension_semantics<arbitrary>], iteration_bounds = array<i64: 1, 1, 1>, scalar_prefetch = 0 : i64, scratch_operands = 1 : i64, tpu.core_type = #tpu.core_type<tc>, window_params = [{transform_indices = @transform_0, window_bounds = array<i64: 32, 32>}, {transform_indices = @transform_1, window_bounds = array<i64: 32, 96>}, {transform_indices = @transform_2, window_bounds = array<i64: 1, 96>}, {transform_indices = @transform_3, window_bounds = array<i64: 32, 96>}]} {
    %c0_i32 = arith.constant 0 : i32
    %0 = arith.cmpi eq, %arg2, %c0_i32 : i32
    %1 = arith.extui %0 : i1 to i32
    %c0_i32_0 = arith.constant 0 : i32
    %2 = arith.cmpi ne, %1, %c0_i32_0 : i32
    scf.if %2 {
      %cst_10 = arith.constant 0.000000e+00 : f32
      %12 = vector.broadcast %cst_10 : f32 to vector<32x96xf32>
      %c0_11 = arith.constant 0 : index
      %c0_12 = arith.constant 0 : index
      %13 = vector.load %arg7[%c0_11, %c0_12] : memref<32x96xf32, #tpu.memory_space<vmem>>, vector<32x96xf32>
      tpu.vector_store %arg7[%c0_11, %c0_12], %12 {strides = array<i32>} : memref<32x96xf32, #tpu.memory_space<vmem>>, vector<32x96xf32>,
    } else {
    }
    %c0 = arith.constant 0 : index
    %c0_1 = arith.constant 0 : index
    %3 = vector.load %arg7[%c0, %c0_1] : memref<32x96xf32, #tpu.memory_space<vmem>>, vector<32x96xf32>
    %c0_2 = arith.constant 0 : index
    %c0_3 = arith.constant 0 : index
    %4 = vector.load %arg3[%c0_2, %c0_3] : memref<32x32xf32, #tpu.memory_space<vmem>>, vector<32x32xf32>
    %c0_4 = arith.constant 0 : index
    %c0_5 = arith.constant 0 : index
    %5 = vector.load %arg4[%c0_4, %c0_5] : memref<32x96xf32, #tpu.memory_space<vmem>>, vector<32x96xf32>
    %cst = arith.constant dense<0.000000e+00> : vector<32x96xf32>
    %6 = tpu.matmul %4, %5, %cst {dimension_numbers = #tpu.dot_dimension_numbers<[1], [0], [0], [1], [0, 0, 1, 1], [], []>} : vector<32x32xf32>, vector<32x96xf32>, vector<32x96xf32> -> vector<32x96xf32>
    %7 = arith.addf %3, %6 : vector<32x96xf32>
    %c0_6 = arith.constant 0 : index
    %c0_7 = arith.constant 0 : index
    %8 = vector.load %arg7[%c0_6, %c0_7] : memref<32x96xf32, #tpu.memory_space<vmem>>, vector<32x96xf32>
    tpu.vector_store %arg7[%c0_6, %c0_7], %7 {strides = array<i32>} : memref<32x96xf32, #tpu.memory_space<vmem>>, vector<32x96xf32>,
    %c0_i32_8 = arith.constant 0 : i32
    %9 = arith.cmpi eq, %arg2, %c0_i32_8 : i32
    %10 = arith.extui %9 : i1 to i32
    %c0_i32_9 = arith.constant 0 : i32
    %11 = arith.cmpi ne, %10, %c0_i32_9 : i32
    scf.if %11 {
      %c0_10 = arith.constant 0 : index
      %c0_11 = arith.constant 0 : index
      %12 = vector.load %arg7[%c0_10, %c0_11] : memref<32x96xf32, #tpu.memory_space<vmem>>, vector<32x96xf32>
      %c0_12 = arith.constant 0 : index
      %c0_13 = arith.constant 0 : index
      %13 = vector.load %arg5[%c0_12, %c0_13] : memref<1x96xf32, #tpu.memory_space<vmem>>, vector<1x96xf32>
      %14 = vector.broadcast %13 : vector<1x96xf32> to vector<32x96xf32>
      %15 = arith.addf %12, %14 : vector<32x96xf32>
      %c0_14 = arith.constant 0 : index
      %c0_15 = arith.constant 0 : index
      %16 = vector.load %arg6[%c0_14, %c0_15] : memref<32x96xf32, #tpu.memory_space<vmem>>, vector<32x96xf32>
      tpu.vector_store %arg6[%c0_14, %c0_15], %15 {strides = array<i32>} : memref<32x96xf32, #tpu.memory_space<vmem>>, vector<32x96xf32>,
    } else {
    }
    return
  }
  func.func @transform_0(%arg0: i32, %arg1: i32, %arg2: i32) -> (i32, i32) {
    %c0_i32 = arith.constant 0 : i32
    return %arg0, %arg2 : i32, i32
  }
  func.func @transform_1(%arg0: i32, %arg1: i32, %arg2: i32) -> (i32, i32) {
    %c0_i32 = arith.constant 0 : i32
    return %arg2, %arg1 : i32, i32
  }
  func.func @transform_2(%arg0: i32, %arg1: i32, %arg2: i32) -> (i32, i32) {
    %c0_i32 = arith.constant 0 : i32
    %c0_i32_0 = arith.constant 0 : i32
    return %c0_i32, %arg1 : i32, i32
  }
  func.func @transform_3(%arg0: i32, %arg1: i32, %arg2: i32) -> (i32, i32) {
    %c0_i32 = arith.constant 0 : i32
    return %arg0, %arg1 : i32, i32
  }
}

</mosaic_0001>

<bundles_post_ra>
// kernel: tpu_custom_call.1
= control target key start
LH: loop header
LB: loop body
LE: loop exit
PB: predicated region body
PF: predicated region fallthrough
CT: control target
= control target key end

     0   :  { %8 = vsyncpa [#allocation4], 0  ;;  %s318_s0 = inlined_call_operand.hbm [shape: f32[32,32], index: 0, kind: input, shape index: {}]   ;;  %s319_s1 = inlined_call_operand.hbm [shape: f32[32,96], index: 1, kind: input, shape index: {}]   ;;  %s320_s2 = inlined_call_operand.vmem [shape: f32[1,96], index: 2, kind: input, shape index: {}]   ;;  %s321_s3 = inlined_call_operand.hbm [shape: f32[32,96], index: 3, kind: output, shape index: {}]  }
   0x1   :  { %9 = vsyncpa [#allocation7], 0 }
   0x2   :  { %10 = vsyncpa [#allocation5], 0  ;;  %s15_s14 = sshll.u32 %s318_s0, 4  ;;  %s259_s15 = smov [#allocation3]   ;;  %s16_s14 = int_to_ptr.hbm [resolvable:$true] %s15_s14 }
   0x3   :  { %s17_s16 = sshll.u32 %s259_s15, 4  ;;  %s28_s19 = sshll.u32 %s319_s1, 4  ;;  %s18_s16 = int_to_ptr.vmem [resolvable:$true] %s17_s16  ;;  %s29_s19 = int_to_ptr.hbm [resolvable:$true] %s28_s19 }
   0x4   :  { %s260_s20 = smov 128   ;;  %s261_s21 = smov 8  }
   0x5   :  { %23 = dma.hbm_to_vmem [thread:$0]  %s16_s14, 512, %s18_s16, [#allocation4], %s260_s20, %s260_s20, %s261_s21  }
   0x6   :  { %s262_s22 = smov [#allocation6]  }
   0x7   :  { %s30_s23 = sshll.u32 %s262_s22, 4  ;;  %s31_s23 = int_to_ptr.vmem [resolvable:$true] %s30_s23 }
   0x8   :  { %36 = dma.hbm_to_vmem [thread:$0]  %s29_s19, 512, %s31_s23, [#allocation7], %s260_s20, %s260_s20, %s261_s21  }
   0x9   :  { %253 = dma.done.wait [#allocation4], 512  }
   0xa   :  { %254 = vsyncadd [#allocation4], 4294966784 }
   0xb   :  { %255 = dma.done.wait [#allocation7], 512  }
   0xc   :  { %256 = vsyncadd [#allocation7], 4294966784  ;;  %vm51_vm0 = vcmask 785408   ;;  %v263_v0 = vmov 0.0   ;;  %v67_v1 = vld [vmem:[#allocation6 + $0x18] sm:$0xff]  ;;  %v66_v2 = vld [vmem:[#allocation6 + $0x10] sm:$0xff] }
   0xd   :  { %52 = vst.msk [vmem:[#allocation2] sm:$0xff] %vm51_vm0, %v263_v0  ;;  %163 = vmatpush.msra.mxu2 %v67_v1  ;;  %164 = vmatpush.msra.mxu3 %v67_v1  ;;  %v65_v3 = vld [vmem:[#allocation6 + $0x8] sm:$0xff]  ;;  %v64_v4 = vld [vmem:[#allocation6] sm:$0xff]  ;;  %v62_v5 = vld [vmem:[#allocation3 + $0x10] sm:$0xff]  ;;  %vm68_vm1 = vcmask 261120   ;;  %s264_s24 = smov [#allocation8]  }
   0xe   :  { %53 = vst.msk [vmem:[#allocation2 + $0x8] sm:$0xff] %vm51_vm0, %v263_v0  ;;  %93 = vmatpush.msra.mxu0 %v67_v1  ;;  %162 = vmatpush.msra.mxu1 %v67_v1  ;;  %v63_v6 = vld [vmem:[#allocation3 + $0x18] sm:$0xff]  ;;  %v60_v7 = vld [vmem:[#allocation3] sm:$0xff]  ;;  %v61_v8 = vld [vmem:[#allocation3 + $0x8] sm:$0xff]  ;;  %s142_s25 = sshll.u32 %s264_s24, 4  ;;  %s144_s28 = sshll.u32 %s321_s3, 4  ;;  %s143_s25 = int_to_ptr.vmem [resolvable:$true] %s142_s25  ;;  %s145_s28 = int_to_ptr.hbm [resolvable:$true] %s144_s28 }
   0xf   :  { %54 = vst.msk [vmem:[#allocation2 + $0x10] sm:$0xff] %vm51_vm0, %v263_v0  ;;  %166 = vmatpush.msra.mxu2 %v66_v2  ;;  %167 = vmatpush.msra.mxu3 %v66_v2  ;;  %v180_v21 = vld [vmem:[%s320_s2] ss:$0 sm:$0xff] }
  0x10   :  { %55 = vst.msk [vmem:[#allocation2 + $0x18] sm:$0xff] %vm51_vm0, %v263_v0  ;;  %94 = vmatpush.msra.mxu0 %v66_v2  ;;  %165 = vmatpush.msra.mxu1 %v66_v2 }
  0x11   :  { %169 = vmatpush.msra.mxu2 %v65_v3  ;;  %170 = vmatpush.msra.mxu3 %v65_v3 }
  0x12   :  { %95 = vmatpush.msra.mxu0 %v65_v3  ;;  %168 = vmatpush.msra.mxu1 %v65_v3 }
  0x13   :  { %172 = vmatpush.msra.mxu2 %v64_v4  ;;  %173 = vmatpush.msra.mxu3 %v64_v4 }
  0x14   :  { %160 = vmatmul.msk.f32.vlgmr.msra.gmra.mxu2 %vm68_vm1, %v62_v5  ;;  %161 = vmatmul.msk.f32.vlgmr.msra.gmra.mxu3 %vm68_vm1, %v63_v6  ;;  %v56_v9 = vld [vmem:[#allocation2] sm:$0xff] }
  0x15   :  { %96 = vmatpush.msra.mxu0 %v64_v4  ;;  %171 = vmatpush.msra.mxu1 %v64_v4  ;;  %v57_v10 = vld [vmem:[#allocation2 + $0x8] sm:$0xff] }
  0x16   :  { %158 = vmatmul.msk.f32.vlgmr.msra.gmra.mxu0 %vm68_vm1, %v60_v7  ;;  %159 = vmatmul.msk.f32.vlgmr.msra.gmra.mxu1 %vm68_vm1, %v61_v8  ;;  %v58_v15 = vld [vmem:[#allocation2 + $0x10] sm:$0xff] }
  0x17   :  { %v59_v16 = vld [vmem:[#allocation2 + $0x18] sm:$0xff] }
  0x93   :  { %v98_v11 = vpop.f32.mrf.mxu0  ;;  %v101_v12 = vpop.f32.mrf.mxu1 }
  0x94   :  { %v110_v13 = vadd.f32 %v98_v11, %v56_v9  ;;  %v111_v14 = vadd.f32 %v101_v12, %v57_v10 }
  0x96   :  { %115 = vst.msk [vmem:[#allocation2] sm:$0xff] %vm51_vm0, %v110_v13 }
  0x97   :  { %116 = vst.msk [vmem:[#allocation2 + $0x8] sm:$0xff] %vm51_vm0, %v111_v14  ;;  %v104_v17 = vpop.f32.mrf.mxu2  ;;  %v107_v18 = vpop.f32.mrf.mxu3 }
  0x98   :  { %v112_v19 = vadd.f32 %v104_v17, %v58_v15  ;;  %v113_v20 = vadd.f32 %v107_v18, %v59_v16 }
  0x9a   :  { %117 = vst.msk [vmem:[#allocation2 + $0x10] sm:$0xff] %vm51_vm0, %v112_v19 }
  0x9b   :  { %118 = vst.msk [vmem:[#allocation2 + $0x18] sm:$0xff] %vm51_vm0, %v113_v20 }
  0x9d   :  { %v122_v22 = vld [vmem:[#allocation2] sm:$0xff] }
  0x9e   :  { %v123_v23 = vld [vmem:[#allocation2 + $0x8] sm:$0xff]  ;;  %v130_v24 = vadd.f32 %v180_v21, %v122_v22 }
  0x9f   :  { %v131_v25 = vadd.f32 %v180_v21, %v123_v23 }
  0xa0   :  { %134 = vst.msk [vmem:[#allocation8] sm:$0xff] %vm51_vm0, %v130_v24 }
  0xa1   :  { %v124_v26 = vld [vmem:[#allocation2 + $0x10] sm:$0xff]  ;;  %135 = vst.msk [vmem:[#allocation8 + $0x8] sm:$0xff] %vm51_vm0, %v131_v25 }
  0xa2   :  { %v125_v27 = vld [vmem:[#allocation2 + $0x18] sm:$0xff]  ;;  %v132_v28 = vadd.f32 %v180_v21, %v124_v26 }
  0xa3   :  { %v133_v29 = vadd.f32 %v180_v21, %v125_v27 }
  0xa4   :  { %136 = vst.msk [vmem:[#allocation8 + $0x10] sm:$0xff] %vm51_vm0, %v132_v28 }
  0xa5   :  { %137 = vst.msk [vmem:[#allocation8 + $0x18] sm:$0xff] %vm51_vm0, %v133_v29 }
  0xa6   :  { %150 = dma.vmem_to_hbm [thread:$0]  %s143_s25, 512, %s145_s28, [#allocation5], %s260_s20, %s260_s20, %s261_s21  }
  0xa7   :  { %257 = dma.done.wait [#allocation5], 512  }
  0xa8   :  { %258 = vsyncadd [#allocation5], 4294966784 }
  0xa9   :  { %155 = vsyncpa [#allocation4], 1 }
  0xaa   :  { %156 = vsyncpa [#allocation7], 1 }
  0xab   :  { %157 = vsyncpa [#allocation5], 1 }

</bundles_post_ra>
